<compile_context>
chip_gen: v7x
topology: tpu7x:2x2x1
jax: 0.10.0
libtpu: 0.0.40
codegen_flags: <defaults>
</compile_context>

<pallas_src>
import jax
import jax.numpy as jnp
from jax.experimental import pallas as pl
from jax.experimental.pallas import tpu as pltpu


def _round_up(x, m):
    return (x + m - 1) // m * m


def _choose_tile_b(B, c_in, c_out, K, Np, itm):
    """Largest whole-batch tile that is sublane-aligned and fits a VMEM budget."""
    fixed = 3 * Np * Np * itm + K * c_out * c_in * 4 + 2 * c_out * 4   # adjT (2 bufs + value) & weights

    def need(tb):
        tbc, tbo = tb * c_in, tb * c_out
        return fixed + (2 * tbc * Np * itm     # x tile, double-buffered
                        + 2 * tbo * Np * 4     # out tile, double-buffered
                        + K * tbc * Np * 4     # hop-feature scratch
                        + 4 * tbc * Np * 4)    # headroom for matmul value temporaries

    aligned = [tb for tb in range(B, 0, -1)
               if B % tb == 0 and (tb == B or (tb * c_in % 8 == 0 and tb * c_out % 8 == 0))]
    for tb in aligned:
        if need(tb) <= (40 << 20):
            return tb, need(tb)
    tb = aligned[-1]                 # smallest aligned tile; may still be large for huge N
    return tb, need(tb)


def gcn_conv_hop_kernel(x_ref, adjT_ref, w_ref, b_ref, o_ref, y_ref):
    """One batch-tile grid step.

    x_ref:    (TBC, Np)        TBC = TILE_B * c_in, compute dtype (f32 / bf16)
    adjT_ref: (Np, Np)         adjT[n, q] = adj[q, n]; VMEM-resident (constant index map)
    w_ref:    (K, c_out, c_in) f32 per-hop 1x1-conv weight, w[k, o, c] = W[o, c*K + k]
    b_ref:    (c_out, 1)       f32 bias
    o_ref:    (TBO, Np)        TBO = TILE_B * c_out, lane-dense output slab tile
    y_ref:    (K, TBC, Np)     f32 scratch: Chebyshev-propagated features per hop
    """
    K, c_out, c_in = w_ref.shape
    TBC, Np = x_ref.shape
    TB = TBC // c_in
    cdt = x_ref.dtype

    adjT = adjT_ref[...]                     # hoisted: reused by every hop matmul
    x = x_ref[...]

    # --- Chebyshev recurrence on the propagated features (batch folded into MXU M) ---
    y_ref[0] = x.astype(jnp.float32)                                     # T_0 = I
    y_ref[1] = jnp.dot(x, adjT, preferred_element_type=jnp.float32)      # T_1 = adj
    for k in range(2, K):                    # static unroll, K is small
        y_ref[k] = 2.0 * jnp.dot(y_ref[k - 1].astype(cdt), adjT,
                                 preferred_element_type=jnp.float32) - y_ref[k - 2]

    # --- 1x1 conv over (c_in, K) + bias, per batch sample (flops are negligible) ---
    bias = b_ref[...]
    for b in range(TB):                      # static unroll
        acc = jnp.zeros((c_out, Np), jnp.float32)
        for k in range(K):
            acc += jnp.dot(w_ref[k], y_ref[k, b * c_in:(b + 1) * c_in, :],
                           preferred_element_type=jnp.float32)
        o_ref[b * c_out:(b + 1) * c_out, :] = (acc + bias).astype(o_ref.dtype)


def gcn_conv_hop_forward(x, adj, weight, bias, K, *, compute_dtype=jnp.float32):
    """x: [B, c_in, N], adj: [N, N], weight: [c_out, K*c_in], bias: [c_out].

    Returns [B, c_out, N].  Requires K >= 2 (mirrors the PyTorch module).
    compute_dtype=jnp.bfloat16 casts only the matmul operands x / adjT; the
    recurrence combine, conv, bias and output stay float32.
    """
    assert K >= 2, "gcn_conv_hop requires K >= 2 (Chebyshev stack always holds [I, adj])"
    B, c_in, N = x.shape
    c_out = weight.shape[0]
    BC = B * c_in

    Np = _round_up(max(N, 128), 128)
    itm = jnp.dtype(compute_dtype).itemsize

    # lane-dense operands, node dim zero-padded to a multiple of 128
    x2 = jnp.pad(x.reshape(BC, N), ((0, 0), (0, Np - N))).astype(compute_dtype)
    adjT = jnp.pad(adj.T, ((0, Np - N), (0, Np - N))).astype(compute_dtype)
    # TODO(synk): for N so large that adjT cannot stay VMEM-resident, stream adjT in
    # n/q tiles with hops on the grid instead of keeping it as one resident block.

    # torch flat input channel i = c*K + k  ->  per-hop weight [K, c_out, c_in]
    w3 = jnp.transpose(weight.reshape(c_out, c_in, K), (2, 0, 1)).astype(jnp.float32)
    b2 = bias.astype(jnp.float32).reshape(c_out, 1)

    TILE_B, vmem_need = _choose_tile_b(B, c_in, c_out, K, Np, itm)
    TBC, TBO = TILE_B * c_in, TILE_B * c_out
    grid = (B // TILE_B,)

    cost = pl.CostEstimate(
        flops=2 * BC * Np * Np * (K - 1) + 2 * B * c_out * c_in * K * Np,
        transcendentals=0,
        bytes_accessed=int(x2.size * itm + adjT.size * itm + w3.size * 4 + b2.size * 4
                           + B * c_out * Np * jnp.dtype(x.dtype).itemsize),
    )

    out2 = pl.pallas_call(
        gcn_conv_hop_kernel,
        out_shape=jax.ShapeDtypeStruct((B * c_out, Np), x.dtype),
        grid=grid,
        in_specs=[
            pl.BlockSpec((TBC, Np), lambda bi: (bi, 0)),            # x rows for this batch tile
            pl.BlockSpec((Np, Np), lambda bi: (0, 0)),              # adjT, resident (const index)
            pl.BlockSpec((K, c_out, c_in), lambda bi: (0, 0, 0)),   # per-hop conv weight
            pl.BlockSpec((c_out, 1), lambda bi: (0, 0)),            # bias
        ],
        out_specs=pl.BlockSpec((TBO, Np), lambda bi: (bi, 0)),
        scratch_shapes=[pltpu.VMEM((K, TBC, Np), jnp.float32)],
        compiler_params=pltpu.CompilerParams(
            dimension_semantics=("parallel",),
            vmem_limit_bytes=int(min(max(vmem_need * 5 // 4 + (2 << 20), 16 << 20), 48 << 20)),
        ),
        cost_estimate=cost,
    )(x2, adjT, w3, b2)

    # drop node padding, unfold batch
    return out2[:, :N].reshape(B, c_out, N)


def gcn_conv_hop_reference(x, adj, weight, bias, K):
    """Pure-JAX transcription of the PyTorch forward, for verification."""
    B, c_in, N = x.shape
    Ls = [jnp.eye(N, dtype=adj.dtype), adj]
    L0, L1 = Ls[0], Ls[1]
    for _ in range(2, K):
        L2 = 2.0 * jnp.matmul(adj, L1) - L0
        L0, L1 = L1, L2
        Ls.append(L2)
    Lap = jnp.transpose(jnp.stack(Ls, 0), (0, 2, 1))
    x2 = jnp.einsum('bcn,knq->bckq', x, Lap)
    x2 = x2.reshape(B, c_in * K, N)
    return jnp.einsum('oi,bin->bon', weight, x2) + bias[None, :, None]


if __name__ == "__main__":
    B, c_in, c_out, K, N = 2, 4, 8, 3, 16

    key = jax.random.PRNGKey(0)
    kx, kadj, kw, kb = jax.random.split(key, 4)

    x = jax.random.normal(kx, (B, c_in, N), dtype=jnp.float32)
    a = jax.random.normal(kadj, (N, N), dtype=jnp.float32)
    adj = 0.5 * (a + a.T) / N                       # symmetric "laplacian"-like adjacency

    # Conv1d(K*c_in, c_out, kernel_size=1) params: weight [c_out, K*c_in], bias [c_out]
    fan_in = K * c_in
    bound = 1.0 / (fan_in ** 0.5)
    weight = jax.random.uniform(kw, (c_out, K * c_in), jnp.float32, -bound, bound)
    bias = jax.random.uniform(kb, (c_out,), jnp.float32, -bound, bound)

    ref = gcn_conv_hop_reference(x, adj, weight, bias, K)

    # f32 path: exact-semantics check
    out = jax.block_until_ready(gcn_conv_hop_forward(x, adj, weight, bias, K))
    assert out.shape == (B, c_out, N)
    assert jnp.allclose(out, ref, atol=1e-5, rtol=1e-5)

    # bf16 operand path (v5e/v6e/v7x MXU); f32 accumulate -> loose tolerance
    out_bf16 = jax.block_until_ready(
        gcn_conv_hop_forward(x, adj, weight, bias, K, compute_dtype=jnp.bfloat16))
    assert out_bf16.shape == (B, c_out, N)
    assert jnp.allclose(out_bf16, ref, atol=5e-2, rtol=5e-2)

    print("KERNEL_OK")
</pallas_src>

<mosaic_0001>
module attributes {stable_mosaic.version = 11 : i64} {
  func.func @gcn_conv_hop_kernel(%arg0: i32, %arg1: memref<8x128xf32, #tpu.memory_space<vmem>>, %arg2: memref<128x128xf32, #tpu.memory_space<vmem>>, %arg3: memref<3x8x4xf32, #tpu.memory_space<vmem>>, %arg4: memref<8x1xf32, #tpu.memory_space<vmem>>, %arg5: memref<16x128xf32, #tpu.memory_space<vmem>>, %arg6: memref<3x8x128xf32, #tpu.memory_space<vmem>>) attributes {dimension_semantics = [#tpu.dimension_semantics<parallel>], iteration_bounds = array<i64: 1>, scalar_prefetch = 0 : i64, scratch_operands = 1 : i64, tpu.core_type = #tpu.core_type<tc>, window_params = [{transform_indices = @transform_0, window_bounds = array<i64: 8, 128>}, {pipeline_mode = #tpu.pipeline_mode<synchronous>, transform_indices = @transform_1, window_bounds = array<i64: 128, 128>}, {pipeline_mode = #tpu.pipeline_mode<synchronous>, transform_indices = @transform_2, window_bounds = array<i64: 3, 8, 4>}, {pipeline_mode = #tpu.pipeline_mode<synchronous>, transform_indices = @transform_3, window_bounds = array<i64: 8, 1>}, {transform_indices = @transform_4, window_bounds = array<i64: 16, 128>}]} {
    %c0 = arith.constant 0 : index
    %c0_0 = arith.constant 0 : index
    %0 = vector.load %arg2[%c0, %c0_0] : memref<128x128xf32, #tpu.memory_space<vmem>>, vector<128x128xf32>
    %c0_1 = arith.constant 0 : index
    %c0_2 = arith.constant 0 : index
    %1 = vector.load %arg1[%c0_1, %c0_2] : memref<8x128xf32, #tpu.memory_space<vmem>>, vector<8x128xf32>
    %c0_3 = arith.constant 0 : index
    %c0_4 = arith.constant 0 : index
    %c0_5 = arith.constant 0 : index
    %2 = vector.load %arg6[%c0_3, %c0_4, %c0_5] : memref<3x8x128xf32, #tpu.memory_space<vmem>>, vector<1x8x128xf32>
    %3 = vector.shape_cast %2 : vector<1x8x128xf32> to vector<8x128xf32>
    %4 = vector.shape_cast %1 : vector<8x128xf32> to vector<1x8x128xf32>
    tpu.vector_store %arg6[%c0_3, %c0_4, %c0_5], %4 {strides = array<i32>} : memref<3x8x128xf32, #tpu.memory_space<vmem>>, vector<1x8x128xf32>,
    %cst = arith.constant dense<0.000000e+00> : vector<8x128xf32>
    %5 = tpu.matmul %1, %0, %cst {dimension_numbers = #tpu.dot_dimension_numbers<[1], [0], [0], [1], [0, 0, 1, 1], [], []>} : vector<8x128xf32>, vector<128x128xf32>, vector<8x128xf32> -> vector<8x128xf32>
    %c1 = arith.constant 1 : index
    %c0_6 = arith.constant 0 : index
    %c0_7 = arith.constant 0 : index
    %6 = vector.load %arg6[%c1, %c0_6, %c0_7] : memref<3x8x128xf32, #tpu.memory_space<vmem>>, vector<1x8x128xf32>
    %7 = vector.shape_cast %6 : vector<1x8x128xf32> to vector<8x128xf32>
    %8 = vector.shape_cast %5 : vector<8x128xf32> to vector<1x8x128xf32>
    tpu.vector_store %arg6[%c1, %c0_6, %c0_7], %8 {strides = array<i32>} : memref<3x8x128xf32, #tpu.memory_space<vmem>>, vector<1x8x128xf32>,
    %c1_8 = arith.constant 1 : index
    %c0_9 = arith.constant 0 : index
    %c0_10 = arith.constant 0 : index
    %9 = vector.load %arg6[%c1_8, %c0_9, %c0_10] : memref<3x8x128xf32, #tpu.memory_space<vmem>>, vector<1x8x128xf32>
    %10 = vector.shape_cast %9 : vector<1x8x128xf32> to vector<8x128xf32>
    %cst_11 = arith.constant dense<0.000000e+00> : vector<8x128xf32>
    %11 = tpu.matmul %10, %0, %cst_11 {dimension_numbers = #tpu.dot_dimension_numbers<[1], [0], [0], [1], [0, 0, 1, 1], [], []>} : vector<8x128xf32>, vector<128x128xf32>, vector<8x128xf32> -> vector<8x128xf32>
    %cst_12 = arith.constant 2.000000e+00 : f32
    %12 = vector.broadcast %cst_12 : f32 to vector<8x128xf32>
    %13 = arith.mulf %12, %11 : vector<8x128xf32>
    %c0_13 = arith.constant 0 : index
    %c0_14 = arith.constant 0 : index
    %c0_15 = arith.constant 0 : index
    %14 = vector.load %arg6[%c0_13, %c0_14, %c0_15] : memref<3x8x128xf32, #tpu.memory_space<vmem>>, vector<1x8x128xf32>
    %15 = vector.shape_cast %14 : vector<1x8x128xf32> to vector<8x128xf32>
    %16 = arith.subf %13, %15 : vector<8x128xf32>
    %c2 = arith.constant 2 : index
    %c0_16 = arith.constant 0 : index
    %c0_17 = arith.constant 0 : index
    %17 = vector.load %arg6[%c2, %c0_16, %c0_17] : memref<3x8x128xf32, #tpu.memory_space<vmem>>, vector<1x8x128xf32>
    %18 = vector.shape_cast %17 : vector<1x8x128xf32> to vector<8x128xf32>
    %19 = vector.shape_cast %16 : vector<8x128xf32> to vector<1x8x128xf32>
    tpu.vector_store %arg6[%c2, %c0_16, %c0_17], %19 {strides = array<i32>} : memref<3x8x128xf32, #tpu.memory_space<vmem>>, vector<1x8x128xf32>,
    %c0_18 = arith.constant 0 : index
    %c0_19 = arith.constant 0 : index
    %20 = vector.load %arg4[%c0_18, %c0_19] : memref<8x1xf32, #tpu.memory_space<vmem>>, vector<8x1xf32>
    %cst_20 = arith.constant 0.000000e+00 : f32
    %21 = vector.broadcast %cst_20 : f32 to vector<8x128xf32>
    %c0_21 = arith.constant 0 : index
    %c0_22 = arith.constant 0 : index
    %c0_23 = arith.constant 0 : index
    %22 = vector.load %arg3[%c0_21, %c0_22, %c0_23] : memref<3x8x4xf32, #tpu.memory_space<vmem>>, vector<1x8x4xf32>
    %23 = vector.shape_cast %22 : vector<1x8x4xf32> to vector<8x4xf32>
    %c0_24 = arith.constant 0 : index
    %c0_25 = arith.constant 0 : index
    %c0_26 = arith.constant 0 : index
    %24 = vector.load %arg6[%c0_24, %c0_25, %c0_26] : memref<3x8x128xf32, #tpu.memory_space<vmem>>, vector<1x4x128xf32>
    %25 = vector.shape_cast %24 : vector<1x4x128xf32> to vector<4x128xf32>
    %cst_27 = arith.constant dense<0.000000e+00> : vector<8x128xf32>
    %26 = tpu.matmul %23, %25, %cst_27 {dimension_numbers = #tpu.dot_dimension_numbers<[1], [0], [0], [1], [0, 0, 1, 1], [], []>} : vector<8x4xf32>, vector<4x128xf32>, vector<8x128xf32> -> vector<8x128xf32>
    %27 = arith.addf %21, %26 : vector<8x128xf32>
    %c1_28 = arith.constant 1 : index
    %c0_29 = arith.constant 0 : index
    %c0_30 = arith.constant 0 : index
    %28 = vector.load %arg3[%c1_28, %c0_29, %c0_30] : memref<3x8x4xf32, #tpu.memory_space<vmem>>, vector<1x8x4xf32>
    %29 = vector.shape_cast %28 : vector<1x8x4xf32> to vector<8x4xf32>
    %c1_31 = arith.constant 1 : index
    %c0_32 = arith.constant 0 : index
    %c0_33 = arith.constant 0 : index
    %30 = vector.load %arg6[%c1_31, %c0_32, %c0_33] : memref<3x8x128xf32, #tpu.memory_space<vmem>>, vector<1x4x128xf32>
    %31 = vector.shape_cast %30 : vector<1x4x128xf32> to vector<4x128xf32>
    %cst_34 = arith.constant dense<0.000000e+00> : vector<8x128xf32>
    %32 = tpu.matmul %29, %31, %cst_34 {dimension_numbers = #tpu.dot_dimension_numbers<[1], [0], [0], [1], [0, 0, 1, 1], [], []>} : vector<8x4xf32>, vector<4x128xf32>, vector<8x128xf32> -> vector<8x128xf32>
    %33 = arith.addf %27, %32 : vector<8x128xf32>
    %c2_35 = arith.constant 2 : index
    %c0_36 = arith.constant 0 : index
    %c0_37 = arith.constant 0 : index
    %34 = vector.load %arg3[%c2_35, %c0_36, %c0_37] : memref<3x8x4xf32, #tpu.memory_space<vmem>>, vector<1x8x4xf32>
    %35 = vector.shape_cast %34 : vector<1x8x4xf32> to vector<8x4xf32>
    %c2_38 = arith.constant 2 : index
    %c0_39 = arith.constant 0 : index
    %c0_40 = arith.constant 0 : index
    %36 = vector.load %arg6[%c2_38, %c0_39, %c0_40] : memref<3x8x128xf32, #tpu.memory_space<vmem>>, vector<1x4x128xf32>
    %37 = vector.shape_cast %36 : vector<1x4x128xf32> to vector<4x128xf32>
    %cst_41 = arith.constant dense<0.000000e+00> : vector<8x128xf32>
    %38 = tpu.matmul %35, %37, %cst_41 {dimension_numbers = #tpu.dot_dimension_numbers<[1], [0], [0], [1], [0, 0, 1, 1], [], []>} : vector<8x4xf32>, vector<4x128xf32>, vector<8x128xf32> -> vector<8x128xf32>
    %39 = arith.addf %33, %38 : vector<8x128xf32>
    %40 = vector.broadcast %20 : vector<8x1xf32> to vector<8x128xf32>
    %41 = arith.addf %39, %40 : vector<8x128xf32>
    %c0_42 = arith.constant 0 : index
    %c0_43 = arith.constant 0 : index
    %42 = vector.load %arg5[%c0_42, %c0_43] : memref<16x128xf32, #tpu.memory_space<vmem>>, vector<8x128xf32>
    tpu.vector_store %arg5[%c0_42, %c0_43], %41 {strides = array<i32>} : memref<16x128xf32, #tpu.memory_space<vmem>>, vector<8x128xf32>,
    %cst_44 = arith.constant 0.000000e+00 : f32
    %43 = vector.broadcast %cst_44 : f32 to vector<8x128xf32>
    %c0_45 = arith.constant 0 : index
    %c0_46 = arith.constant 0 : index
    %c0_47 = arith.constant 0 : index
    %44 = vector.load %arg3[%c0_45, %c0_46, %c0_47] : memref<3x8x4xf32, #tpu.memory_space<vmem>>, vector<1x8x4xf32>
    %45 = vector.shape_cast %44 : vector<1x8x4xf32> to vector<8x4xf32>
    %c0_48 = arith.constant 0 : index
    %c4 = arith.constant 4 : index
    %c0_49 = arith.constant 0 : index
    %46 = vector.load %arg6[%c0_48, %c4, %c0_49] : memref<3x8x128xf32, #tpu.memory_space<vmem>>, vector<1x4x128xf32>
    %47 = vector.shape_cast %46 : vector<1x4x128xf32> to vector<4x128xf32>
    %cst_50 = arith.constant dense<0.000000e+00> : vector<8x128xf32>
    %48 = tpu.matmul %45, %47, %cst_50 {dimension_numbers = #tpu.dot_dimension_numbers<[1], [0], [0], [1], [0, 0, 1, 1], [], []>} : vector<8x4xf32>, vector<4x128xf32>, vector<8x128xf32> -> vector<8x128xf32>
    %49 = arith.addf %43, %48 : vector<8x128xf32>
    %c1_51 = arith.constant 1 : index
    %c0_52 = arith.constant 0 : index
    %c0_53 = arith.constant 0 : index
    %50 = vector.load %arg3[%c1_51, %c0_52, %c0_53] : memref<3x8x4xf32, #tpu.memory_space<vmem>>, vector<1x8x4xf32>
    %51 = vector.shape_cast %50 : vector<1x8x4xf32> to vector<8x4xf32>
    %c1_54 = arith.constant 1 : index
    %c4_55 = arith.constant 4 : index
    %c0_56 = arith.constant 0 : index
    %52 = vector.load %arg6[%c1_54, %c4_55, %c0_56] : memref<3x8x128xf32, #tpu.memory_space<vmem>>, vector<1x4x128xf32>
    %53 = vector.shape_cast %52 : vector<1x4x128xf32> to vector<4x128xf32>
    %cst_57 = arith.constant dense<0.000000e+00> : vector<8x128xf32>
    %54 = tpu.matmul %51, %53, %cst_57 {dimension_numbers = #tpu.dot_dimension_numbers<[1], [0], [0], [1], [0, 0, 1, 1], [], []>} : vector<8x4xf32>, vector<4x128xf32>, vector<8x128xf32> -> vector<8x128xf32>
    %55 = arith.addf %49, %54 : vector<8x128xf32>
    %c2_58 = arith.constant 2 : index
    %c0_59 = arith.constant 0 : index
    %c0_60 = arith.constant 0 : index
    %56 = vector.load %arg3[%c2_58, %c0_59, %c0_60] : memref<3x8x4xf32, #tpu.memory_space<vmem>>, vector<1x8x4xf32>
    %57 = vector.shape_cast %56 : vector<1x8x4xf32> to vector<8x4xf32>
    %c2_61 = arith.constant 2 : index
    %c4_62 = arith.constant 4 : index
    %c0_63 = arith.constant 0 : index
    %58 = vector.load %arg6[%c2_61, %c4_62, %c0_63] : memref<3x8x128xf32, #tpu.memory_space<vmem>>, vector<1x4x128xf32>
    %59 = vector.shape_cast %58 : vector<1x4x128xf32> to vector<4x128xf32>
    %cst_64 = arith.constant dense<0.000000e+00> : vector<8x128xf32>
    %60 = tpu.matmul %57, %59, %cst_64 {dimension_numbers = #tpu.dot_dimension_numbers<[1], [0], [0], [1], [0, 0, 1, 1], [], []>} : vector<8x4xf32>, vector<4x128xf32>, vector<8x128xf32> -> vector<8x128xf32>
    %61 = arith.addf %55, %60 : vector<8x128xf32>
    %62 = vector.broadcast %20 : vector<8x1xf32> to vector<8x128xf32>
    %63 = arith.addf %61, %62 : vector<8x128xf32>
    %c8 = arith.constant 8 : index
    %c0_65 = arith.constant 0 : index
    %64 = vector.load %arg5[%c8, %c0_65] : memref<16x128xf32, #tpu.memory_space<vmem>>, vector<8x128xf32>
    tpu.vector_store %arg5[%c8, %c0_65], %63 {strides = array<i32>} : memref<16x128xf32, #tpu.memory_space<vmem>>, vector<8x128xf32>,
    return
  }
  func.func @transform_0(%arg0: i32) -> (i32, i32) {
    %c0_i32 = arith.constant 0 : i32
    %c0_i32_0 = arith.constant 0 : i32
    return %arg0, %c0_i32 : i32, i32
  }
  func.func @transform_1(%arg0: i32) -> (i32, i32) {
    %c0_i32 = arith.constant 0 : i32
    %c0_i32_0 = arith.constant 0 : i32
    %c0_i32_1 = arith.constant 0 : i32
    return %c0_i32, %c0_i32_0 : i32, i32
  }
  func.func @transform_2(%arg0: i32) -> (i32, i32, i32) {
    %c0_i32 = arith.constant 0 : i32
    %c0_i32_0 = arith.constant 0 : i32
    %c0_i32_1 = arith.constant 0 : i32
    %c0_i32_2 = arith.constant 0 : i32
    return %c0_i32, %c0_i32_0, %c0_i32_1 : i32, i32, i32
  }
  func.func @transform_3(%arg0: i32) -> (i32, i32) {
    %c0_i32 = arith.constant 0 : i32
    %c0_i32_0 = arith.constant 0 : i32
    %c0_i32_1 = arith.constant 0 : i32
    return %c0_i32, %c0_i32_0 : i32, i32
  }
  func.func @transform_4(%arg0: i32) -> (i32, i32) {
    %c0_i32 = arith.constant 0 : i32
    %c0_i32_0 = arith.constant 0 : i32
    return %arg0, %c0_i32 : i32, i32
  }
}

</mosaic_0001>

<bundles_post_ra>
// kernel: tpu_custom_call.1
= control target key start
LH: loop header
LB: loop body
LE: loop exit
PB: predicated region body
PF: predicated region fallthrough
CT: control target
= control target key end

     0   :  { %9 = vsyncpa [#allocation4], 0  ;;  %s1083_s0 = inlined_call_operand.vmem [shape: f32[8,128], index: 0, kind: input, shape index: {}]   ;;  %s1084_s1 = inlined_call_operand.hbm [shape: f32[128,128], index: 1, kind: input, shape index: {}]   ;;  %s1085_s2 = inlined_call_operand.vmem [shape: f32[3,8,4], index: 2, kind: input, shape index: {}]   ;;  %s1086_s3 = inlined_call_operand.vmem [shape: f32[8,1], index: 3, kind: input, shape index: {}]   ;;  %s1087_s4 = inlined_call_operand.hbm [shape: f32[16,128], index: 4, kind: output, shape index: {}]  }
   0x1   :  { %10 = vsyncpa [#allocation5], 0  ;;  %s966_s15 = smov [#allocation3]   ;;  %s918_s19 = scalar_lea.hbm %s1084_s1, 2048 }
   0x2   :  { %s18_s16 = sshll.u32 %s966_s15, 4  ;;  %p919_p0 = scmp.ne.s32.totalorder %s1084_s1, %s918_s19  ;;  %s19_s16 = int_to_ptr.vmem [resolvable:$true] %s18_s16 }
   0x3   :  { %p922_p1 = scmp.lt.u32.totalorder %s918_s19, %s1084_s1 }
   0x5   :  { %p924_p2 = pnand %p922_p1, %p919_p0 }
   0x7   :  { %927 = shalt.err (!%p924_p2)
}
   0x8   :  { %s928_s24 = scalar_lea.vmem %s19_s16, 2048  ;;  %p933_p4 = scmp.lt.s32.totalorder %s19_s16, %s19_s16 }
   0x9   :  { %p929_p3 = scmp.ne.s32.totalorder %s19_s16, %s928_s24  ;;  %p934_p5 = scmp.lt.s32.totalorder %s928_s24, %s928_s24 }
   0xb   :  { %p935_p6 = por %p934_p5, %p933_p4 }
   0xd   :  { %p936_p7 = pnand %p935_p6, %p929_p3 }
   0xf   :  { %939 = shalt.err (!%p936_p7)
}
  0x10   :  { %s967_s25 = smov 128   ;;  %s968_s26 = smov 8  }
  0x11   :  { %24 = dma.hbm_to_vmem [thread:$0]  %s1084_s1, 2048, %s19_s16, [#allocation4], %s967_s25, %s967_s25, %s968_s26  }
  0x12   :  { %962 = dma.done.wait [#allocation4], 2048  }
  0x13   :  { %963 = vsyncadd [#allocation4], 4294965248  ;;  %v969_v0 = vmov 0.0|0.0   ;;  %vm970_vm0 = vmmov 0   ;;  %v971_v1 = vmov 0.0   ;;  %v32_v2 = vld [vmem:[#allocation3] sm:$0xff] }
  0x14   :  { %861 = vmatprep.subr.bf16.mxu0 %v969_v0  ;;  %793 = vmatprep.mubr.msk.f32.mxu0 %vm970_vm0, %v971_v1  ;;  %v33_v3 = vld [vmem:[#allocation3 + $0x8] sm:$0xff]  ;;  %v34_v4 = vld [vmem:[#allocation3 + $0x10] sm:$0xff]  ;;  %v35_v6 = vld [vmem:[#allocation3 + $0x18] sm:$0xff]  ;;  %vm208_vm1 = vcmask 1043456   ;;  %vm204_vm2 = vcmask 31744   ;;  %v972_v35 = vmov 0  }
  0x15   :  { %885 = vmatprep.subr.bf16.mxu1 %v969_v0  ;;  %828 = vmatprep.mubr.msk.f32.mxu1 %vm970_vm0, %v971_v1  ;;  %v862_v5 = vpack.c.bf16 %v33_v3, %v32_v2  ;;  %v865_v7 = vpack.c.bf16 %v35_v6, %v34_v4  ;;  %v36_v8 = vld [vmem:[#allocation3 + $0x20] sm:$0xff]  ;;  %v37_v9 = vld [vmem:[#allocation3 + $0x28] sm:$0xff]  ;;  %v38_v12 = vld [vmem:[#allocation3 + $0x30] sm:$0xff] }
  0x16   :  { %v1021_v10 = vld [vmem:[%s1083_s0] sm:$0xff]  ;;  %v868_v11 = vpack.c.bf16 %v37_v9, %v36_v8  ;;  %v39_v13 = vld [vmem:[#allocation3 + $0x38] sm:$0xff]  ;;  %v40_v15 = vld [vmem:[#allocation3 + $0x40] sm:$0xff]  ;;  %917 = vset.pattern.permute.xlu0 %v972_v35 }
  0x17   :  { %863 = vmatpush3.bf16.msra.mxu0 %v862_v5  ;;  %887 = vmatpush3.bf16.msra.mxu1 %v862_v5  ;;  %49 = vst [vmem:[#allocation2] sm:$0xff] %v1021_v10  ;;  %v871_v14 = vpack.c.bf16 %v39_v13, %v38_v12  ;;  %v41_v16 = vld [vmem:[#allocation3 + $0x48] sm:$0xff]  ;;  %v42_v18 = vld [vmem:[#allocation3 + $0x50] sm:$0xff]  ;;  %v43_v19 = vld [vmem:[#allocation3 + $0x58] sm:$0xff] }
  0x18   :  { %864 = vmatprep.subr.bf16.mxu0 %v969_v0  ;;  %888 = vmatprep.subr.bf16.mxu1 %v969_v0  ;;  %v874_v17 = vpack.c.bf16 %v41_v16, %v40_v15  ;;  %v877_v20 = vpack.c.bf16 %v43_v19, %v42_v18  ;;  %v44_v21 = vld [vmem:[#allocation3 + $0x60] sm:$0xff]  ;;  %v45_v22 = vld [vmem:[#allocation3 + $0x68] sm:$0xff]  ;;  %v46_v24 = vld [vmem:[#allocation3 + $0x70] sm:$0xff] }
  0x19   :  { %v880_v23 = vpack.c.bf16 %v45_v22, %v44_v21  ;;  %v47_v25 = vld [vmem:[#allocation3 + $0x78] sm:$0xff]  ;;  %v199_v30 = vld [vmem:[%s1085_s2] sm:$0xff]  ;;  %v699_v33 = vld [vmem:[%s1085_s2 + $0x8] sm:$0xff] }
  0x1a   :  { %v883_v26 = vpack.c.bf16 %v47_v25, %v46_v24  ;;  %v198_v34 = vld [vmem:[%s1086_s3] sm:$0xff]  ;;  %v704_v42 = vld [vmem:[%s1085_s2 + $0x10] sm:$0xff]  ;;  %s973_s2 = smov [#allocation6]  }
  0x1b   :  { %866 = vmatpush3.bf16.msra.mxu0 %v865_v7  ;;  %890 = vmatpush3.bf16.msra.mxu1 %v865_v7  ;;  %s687_s3 = sshll.u32 %s973_s2, 4  ;;  %s688_s3 = int_to_ptr.vmem [resolvable:$true] %s687_s3 }
  0x1c   :  { %867 = vmatprep.subr.bf16.mxu0 %v969_v0  ;;  %891 = vmatprep.subr.bf16.mxu1 %v969_v0  ;;  %s940_s11 = scalar_lea.vmem %s688_s3, 256  ;;  %p945_p9 = scmp.lt.s32.totalorder %s688_s3, %s688_s3 }
  0x1d   :  { %440 = vperm.xlu0 %917, %v198_v34   ;;  %p941_p8 = scmp.ne.s32.totalorder %s688_s3, %s940_s11  ;;  %p946_p10 = scmp.lt.s32.totalorder %s940_s11, %s940_s11 }
  0x1e   :  { %v200_v27 = vld [vmem:[#allocation2] sm:$0xf]  ;;  %v446_v45 = vld [vmem:[#allocation2 + $0x4] sm:$0xf] }
  0x1f   :  { %869 = vmatpush3.bf16.msra.mxu0 %v868_v11  ;;  %893 = vmatpush3.bf16.msra.mxu1 %v868_v11  ;;  %p947_p11 = por %p946_p10, %p945_p9 }
  0x20   :  { %870 = vmatprep.subr.bf16.mxu0 %v969_v0  ;;  %894 = vmatprep.subr.bf16.mxu1 %v969_v0 }
  0x21   :  { %p948_p12 = pnand %p947_p11, %p941_p8 }
  0x23   :  { %872 = vmatpush3.bf16.msra.mxu0 %v871_v14  ;;  %896 = vmatpush3.bf16.msra.mxu1 %v871_v14 }
  0x24   :  { %873 = vmatprep.subr.bf16.mxu0 %v969_v0  ;;  %897 = vmatprep.subr.bf16.mxu1 %v969_v0 }
  0x27   :  { %875 = vmatpush3.bf16.msra.mxu0 %v874_v17  ;;  %899 = vmatpush3.bf16.msra.mxu1 %v874_v17 }
  0x28   :  { %876 = vmatprep.subr.bf16.mxu0 %v969_v0  ;;  %900 = vmatprep.subr.bf16.mxu1 %v969_v0 }
  0x2b   :  { %878 = vmatpush3.bf16.msra.mxu0 %v877_v20  ;;  %902 = vmatpush3.bf16.msra.mxu1 %v877_v20 }
  0x2c   :  { %879 = vmatprep.subr.bf16.mxu0 %v969_v0  ;;  %903 = vmatprep.subr.bf16.mxu1 %v969_v0 }
  0x2f   :  { %881 = vmatpush3.bf16.msra.mxu0 %v880_v23  ;;  %905 = vmatpush3.bf16.msra.mxu1 %v880_v23 }
  0x30   :  { %882 = vmatprep.subr.bf16.mxu0 %v969_v0  ;;  %906 = vmatprep.subr.bf16.mxu1 %v969_v0 }
  0x33   :  { %884 = vmatpush3.bf16.msra.mxu0 %v883_v26  ;;  %908 = vmatpush3.bf16.msra.mxu1 %v883_v26 }
  0x34   :  { %831 = vmatprep.subr.mxu0 %v971_v1  ;;  %836 = vmatprep.subr.mxu1 %v971_v1 }
  0x36   :  { %794 = vmatmul.mubr.f32.vlgmr.msra.gmra.mrb[0].mxu0 %v1021_v10 }
  0x37   :  { %833 = vmatprep.mubr.msk.f32.mxu0 %vm970_vm0, %v971_v1 }
  0x9c   :  { %v441_v52 = vpop.permute.xlu0 %440 }
 0x109   :  { %v116_v28 = vpop.f32.mrb[0].mxu0 }
 0x10a   :  { %121 = vst [vmem:[#allocation2 + $0x8] sm:$0xff] %v116_v28  ;;  %v795_v29 = vpop.f32.mrb[1].mxu0  ;;  %829 = vmatmul.mubr.f32.vlgmr.msra.gmra.mrb[0].mxu1 %v116_v28 }
 0x10b   :  { %837 = vmatpush3.msk.msra.mxu1 %vm208_vm1, %v200_v27  ;;  %838 = vmatprep.mubr.msk.f32.mxu1 %vm970_vm0, %v971_v1 }
 0x10c   :  { %846 = vmatprep.subr.mxu1 %v971_v1 }
 0x10e   :  { %839 = vmatmul.mubr.msk.f32.vlgmr.msra.gmra.mrb[2].mxu1 %vm204_vm2, %v199_v30 }
 0x10f   :  { %848 = vmatprep.mubr.msk.f32.mxu1 %vm970_vm0, %v971_v1 }
 0x111   :  { %v203_v31 = vld [vmem:[#allocation2 + $0x8] sm:$0xf]  ;;  %v448_v32 = vld [vmem:[#allocation2 + $0xc] sm:$0xf] }
 0x112   :  { %832 = vmatpush3.msk.msra.mxu0 %vm208_vm1, %v203_v31  ;;  %847 = vmatpush3.msk.msra.mxu1 %vm208_vm1, %v448_v32 }
 0x113   :  { %841 = vmatprep.subr.mxu0 %v971_v1  ;;  %856 = vmatprep.subr.mxu1 %v971_v1 }
 0x114   :  { %834 = vmatmul.mubr.msk.f32.vlgmr.msra.gmra.mrb[2].mxu0 %vm204_vm2, %v699_v33  ;;  %849 = vmatmul.mubr.msk.f32.vlgmr.msra.gmra.mrb[4].mxu1 %vm204_vm2, %v699_v33 }
 0x115   :  { %843 = vmatprep.mubr.msk.f32.mxu0 %vm970_vm0, %v971_v1  ;;  %858 = vmatprep.mubr.msk.f32.mxu1 %vm970_vm0, %v971_v1 }
 0x1dd   :  { %v189_v36 = vpop.f32.mrb[0].mxu1 }
 0x1de   :  { %v193_v37 = vmul.f32 2.0, %v189_v36  ;;  %v830_v38 = vpop.f32.mrb[1].mxu1 }
 0x1e0   :  { %v195_v39 = vsub.f32 %v193_v37, %v1021_v10 }
 0x1e1   :  { %v354_v40 = vpop.f32.mrb[2].mxu1 }
 0x1e2   :  { %197 = vst [vmem:[#allocation2 + $0x10] sm:$0xff] %v195_v39  ;;  %v840_v41 = vpop.f32.mrb[3].mxu1 }
 0x1e7   :  { %v278_v46 = vpop.f32.mrb[2].mxu0  ;;  %v521_v49 = vpop.f32.mrb[4].mxu1 }
 0x1e8   :  { %v835_v47 = vpop.f32.mrb[3].mxu0  ;;  %v355_v48 = vadd.f32 %v354_v40, %v278_v46  ;;  %v850_v50 = vpop.f32.mrb[5].mxu1 }
 0x1e9   :  { %v360_v43 = vld [vmem:[#allocation2 + $0x10] sm:$0xf]  ;;  %v602_v44 = vld [vmem:[#allocation2 + $0x14] sm:$0xf] }
 0x1ea   :  { %842 = vmatpush3.msk.msra.mxu0 %vm208_vm1, %v360_v43  ;;  %857 = vmatpush3.msk.msra.mxu1 %vm208_vm1, %v602_v44 }
 0x1eb   :  { %844 = vmatmul.mubr.msk.f32.vlgmr.msra.gmra.mrb[4].mxu0 %vm204_vm2, %v704_v42  ;;  %851 = vmatprep.subr.mxu0 %v971_v1 }
 0x1ec   :  { %852 = vmatpush3.msk.msra.mxu0 %vm208_vm1, %v446_v45  ;;  %853 = vmatprep.mubr.msk.f32.mxu0 %vm970_vm0, %v971_v1 }
 0x1ed   :  { %859 = vmatmul.mubr.msk.f32.vlgmr.msra.gmra.mrb[6].mxu1 %vm204_vm2, %v704_v42 }
 0x1ef   :  { %854 = vmatmul.mubr.msk.f32.vlgmr.msra.gmra.mrb[6].mxu0 %vm204_vm2, %v199_v30 }
 0x2be   :  { %v433_v51 = vpop.f32.mrb[4].mxu0 }
 0x2bf   :  { %v437_v53 = vadd.f32 %v433_v51, %v355_v48  ;;  %v845_v54 = vpop.f32.mrb[5].mxu0 }
 0x2c0   :  { %v675_v55 = vpop.f32.mrb[6].mxu1 }
 0x2c1   :  { %v443_v56 = vadd.f32 %v441_v52, %v437_v53  ;;  %v860_v57 = vpop.f32.mrb[7].mxu1 }
 0x2c2   :  { %v597_v58 = vpop.f32.mrb[6].mxu0 }
 0x2c3   :  { %444 = vst [vmem:[#allocation6] sm:$0xff] %v443_v56  ;;  %v598_v59 = vadd.f32 %v597_v58, %v521_v49  ;;  %v855_v60 = vpop.f32.mrb[7].mxu0 }
 0x2c5   :  { %v679_v61 = vadd.f32 %v675_v55, %v598_v59 }
 0x2c7   :  { %v680_v62 = vadd.f32 %v679_v61, %v441_v52 }
 0x2c9   :  { %681 = vst [vmem:[#allocation6 + $0x8] sm:$0xff] %v680_v62 }
 0x2ca   :  { %951 = shalt.err (!%p948_p12)
}
 0x2cb   :  { %s952_s14 = scalar_lea.hbm %s1087_s4, 256 }
 0x2cc   :  { %p953_p13 = scmp.ne.s32.totalorder %s1087_s4, %s952_s14  ;;  %p956_p0 = scmp.lt.u32.totalorder %s952_s14, %s1087_s4 }
 0x2ce   :  { %p958_p1 = pnand %p956_p0, %p953_p13 }
 0x2d0   :  { %961 = shalt.err (!%p958_p1)
}
 0x2d1   :  { %693 = dma.vmem_to_hbm [thread:$0]  %s688_s3, 256, %s1087_s4, [#allocation5], %s967_s25, %s967_s25, %s968_s26  }
 0x2d2   :  { %964 = dma.done.wait [#allocation5], 256  }
 0x2d3   :  { %965 = vsyncadd [#allocation5], 4294967040 }
 0x2d4   :  { %697 = vsyncpa [#allocation4], 1 }
 0x2d5   :  { %698 = vsyncpa [#allocation5], 1 }

</bundles_post_ra>
